<compile_context>
chip_gen: v7x
topology: tpu7x:2x2x1
jax: 0.10.0
libtpu: 0.0.40
codegen_flags: <defaults>
</compile_context>

<pallas_src>
import functools

import jax
import jax.numpy as jnp
from jax import lax
from jax.experimental import pallas as pl
from jax.experimental.pallas import tpu as pltpu


def _round_up(x, m):
    return ((x + m - 1) // m) * m


def _pick_tile(dim, pref):
    # largest tile <= pref that is a multiple of 128 and does not exceed the padded dim
    return min(pref, _round_up(dim, 128))


def _vmem_limit(nbytes):
    # Explicit scoped-VMEM request: enough for the working set + slack, never above
    # what the smallest physical VMEM (v7x: 64 MiB) can safely grant.
    return int(min(max(nbytes + (4 << 20), 32 << 20), 56 << 20))


def _pad2(a, rows, cols, dtype):
    r, c = a.shape
    return jnp.pad(a.astype(dtype), ((0, rows - r), (0, cols - c)))


# ----------------------------------------------------------------------------- #
# General tiled matmul (MXU) with K-reduction grid.  Used only on the cold path
# (wavelet regularizer, pred matmuls); bf16=False keeps f32 operands.
# ----------------------------------------------------------------------------- #
def _matmul_kernel(a_ref, b_ref, o_ref, acc_ref):
    @pl.when(pl.program_id(2) == 0)
    def _():
        acc_ref[...] = jnp.zeros_like(acc_ref)

    acc_ref[...] += jnp.dot(a_ref[...], b_ref[...], preferred_element_type=jnp.float32)

    @pl.when(pl.program_id(2) == pl.num_programs(2) - 1)
    def _():
        o_ref[...] = acc_ref[...].astype(o_ref.dtype)


def matmul_pallas(a, b, tm=256, tn=256, tk=256, bf16=True):
    M, K = a.shape
    K2, N = b.shape
    assert K == K2
    tm, tn, tk = _pick_tile(M, tm), _pick_tile(N, tn), _pick_tile(K, tk)
    Mp, Kp, Np = _round_up(M, tm), _round_up(K, tk), _round_up(N, tn)
    cdt = jnp.bfloat16 if bf16 else jnp.float32
    a_p = jnp.pad(a.astype(cdt), ((0, Mp - M), (0, Kp - K)))
    b_p = jnp.pad(b.astype(cdt), ((0, Kp - K), (0, Np - N)))
    itemsize = 2 if bf16 else 4
    out = pl.pallas_call(
        _matmul_kernel,
        out_shape=jax.ShapeDtypeStruct((Mp, Np), jnp.float32),
        grid_spec=pltpu.PrefetchScalarGridSpec(
            num_scalar_prefetch=0,
            grid=(Mp // tm, Np // tn, Kp // tk),
            in_specs=[pl.BlockSpec((tm, tk), lambda i, j, k: (i, k)),
                      pl.BlockSpec((tk, tn), lambda i, j, k: (k, j))],
            out_specs=pl.BlockSpec((tm, tn), lambda i, j, k: (i, j)),
            scratch_shapes=[pltpu.VMEM((tm, tn), jnp.float32)]),
        compiler_params=pltpu.CompilerParams(
            dimension_semantics=("parallel", "parallel", "arbitrary")),
        cost_estimate=pl.CostEstimate(
            flops=2 * Mp * Np * Kp, transcendentals=0,
            bytes_accessed=(Mp * Kp + Kp * Np) * itemsize + Mp * Np * 4),
    )(a_p, b_p)
    return out[:M, :N]


# ----------------------------------------------------------------------------- #
# Single-K linear: y = x @ W + b [+ act], weights resident, no accumulator.
# Operates on pre-padded operands; emits padded output in the requested dtype.
# ----------------------------------------------------------------------------- #
def _linear_sk_kernel(x_ref, w_ref, b_ref, o_ref, *, act):
    r = jnp.dot(x_ref[...], w_ref[...], preferred_element_type=jnp.float32) + b_ref[...]
    if act == "relu":
        r = jnp.maximum(r, 0.0)
    elif act == "tanh":
        r = jnp.tanh(r)
    o_ref[...] = r.astype(o_ref.dtype)


def linear_single_k_pallas(x_p, w_p, b_p, out_dtype, act=None, tv=512):
    Vp, Kp = x_p.shape
    Np = w_p.shape[1]
    nvt = Vp // tv
    return pl.pallas_call(
        functools.partial(_linear_sk_kernel, act=act),
        out_shape=jax.ShapeDtypeStruct((Vp, Np), out_dtype),
        grid_spec=pltpu.PrefetchScalarGridSpec(
            num_scalar_prefetch=0, grid=(nvt,),
            in_specs=[pl.BlockSpec((tv, Kp), lambda i: (i, 0)),
                      pl.BlockSpec((Kp, Np), lambda i: (0, 0)),
                      pl.BlockSpec((1, Np), lambda i: (0, 0))],
            out_specs=pl.BlockSpec((tv, Np), lambda i: (i, 0))),
        compiler_params=pltpu.CompilerParams(dimension_semantics=("parallel",)),
        cost_estimate=pl.CostEstimate(
            flops=2 * Vp * Kp * Np, transcendentals=0,
            bytes_accessed=Vp * Kp * 2 + Kp * Np * 2 + Vp * Np * 2),
    )(x_p, w_p, b_p)


# ----------------------------------------------------------------------------- #
# Fused per-block MiniMLP:  one kernel per block.
#   h = relu(x@W0a + xd@W0b + xg@W0c + b0)   (split-K: no [V,3C] concat)
#   h = relu(h@W1 + b1)
#   out = h@W2 + b2 + x                       (fused residual)
# All five (Cp,Cp) bf16 weights + biases resident in VMEM; no HBM round trips for
# the hidden activations.  Dropout layers are identity in eval mode.
# TODO(synk): training-mode dropout not implemented in the kernel path.
# ----------------------------------------------------------------------------- #
def _block_mlp_kernel(x_ref, xd_ref, xg_ref, w0a, w0b, w0c, b0, w1, b1, w2, b2, o_ref):
    x = x_ref[...]
    h = (jnp.dot(x, w0a[...], preferred_element_type=jnp.float32)
         + jnp.dot(xd_ref[...], w0b[...], preferred_element_type=jnp.float32)
         + jnp.dot(xg_ref[...], w0c[...], preferred_element_type=jnp.float32)
         + b0[...])
    h = jnp.maximum(h, 0.0).astype(jnp.bfloat16)
    h = jnp.dot(h, w1[...], preferred_element_type=jnp.float32) + b1[...]
    h = jnp.maximum(h, 0.0).astype(jnp.bfloat16)
    r = jnp.dot(h, w2[...], preferred_element_type=jnp.float32) + b2[...]
    r = r + x.astype(jnp.float32)                       # residual (x = mlp(...) + x)
    o_ref[...] = r.astype(o_ref.dtype)


def block_mlp_fused_pallas(x_p, xd_p, xg_p, w0a, w0b, w0c, b0, w1, b1, w2, b2,
                           Vp, Cp, tv):
    nvt = Vp // tv
    act_spec = pl.BlockSpec((tv, Cp), lambda i: (i, 0))
    w_spec = pl.BlockSpec((Cp, Cp), lambda i: (0, 0))
    b_spec = pl.BlockSpec((1, Cp), lambda i: (0, 0))
    return pl.pallas_call(
        _block_mlp_kernel,
        out_shape=jax.ShapeDtypeStruct((Vp, Cp), jnp.bfloat16),
        grid_spec=pltpu.PrefetchScalarGridSpec(
            num_scalar_prefetch=0, grid=(nvt,),
            in_specs=[act_spec, act_spec, act_spec,
                      w_spec, w_spec, w_spec, b_spec,
                      w_spec, b_spec, w_spec, b_spec],
            out_specs=pl.BlockSpec((tv, Cp), lambda i: (i, 0))),
        compiler_params=pltpu.CompilerParams(dimension_semantics=("parallel",)),
        cost_estimate=pl.CostEstimate(
            flops=10 * Vp * Cp * Cp, transcendentals=0,
            bytes_accessed=4 * Vp * Cp * 2 + 5 * Cp * Cp * 2),
    )(x_p, xd_p, xg_p, w0a, w0b, w0c, b0, w1, b1, w2, b2)


# ----------------------------------------------------------------------------- #
# Spectral diffusion (LearnedTimeDiffusion, method='spectral'), tiled over V.
#   pass 1: spec = exp(-evals*t) * (evecs^T @ (x * mass))   [reduction over V tiles,
#           optionally split 2 ways on the leading "parallel" axis -> both v7x TCs]
#   pass 2: x_diffuse = evecs @ spec                        [parallel over V tiles]
# Activations are padded bf16 in/out; mass stays f32.
# ----------------------------------------------------------------------------- #
def _to_basis_kernel(x_ref, mass_ref, evecs_t_ref, coefs_ref, o_ref, acc_ref):
    i = pl.program_id(1)

    @pl.when(i == 0)
    def _():
        acc_ref[...] = jnp.zeros_like(acc_ref)

    xm = (x_ref[...].astype(jnp.float32) * mass_ref[...]).astype(jnp.bfloat16)
    acc_ref[...] += jnp.dot(evecs_t_ref[...], xm, preferred_element_type=jnp.float32)

    @pl.when(i == pl.num_programs(1) - 1)
    def _():
        o_ref[0] = acc_ref[...] * coefs_ref[...]


def _from_basis_kernel(evecs_ref, spec_ref, o_ref):
    o_ref[...] = jnp.dot(evecs_ref[...], spec_ref[...],
                         preferred_element_type=jnp.float32).astype(o_ref.dtype)


def spectral_diffusion_pallas(x_p, mass_p, evecs_p, evecs_t_p, coefs_p, Vp, Cp, K, tv):
    nvt = Vp // tv
    # split the V reduction across 2 partial accumulators when possible (keeps both
    # v7x TensorCores busy; harmless on single-TC v5e/v6e)
    nsplit = 2 if (nvt % 2 == 0 and nvt >= 2) else 1
    per = nvt // nsplit

    partials = pl.pallas_call(
        _to_basis_kernel,
        out_shape=jax.ShapeDtypeStruct((nsplit, K, Cp), jnp.float32),
        grid_spec=pltpu.PrefetchScalarGridSpec(
            num_scalar_prefetch=0,
            grid=(nsplit, per),
            in_specs=[pl.BlockSpec((tv, Cp), lambda p, i: (p * per + i, 0)),   # x (bf16)
                      pl.BlockSpec((tv, 1), lambda p, i: (p * per + i, 0)),    # mass (f32)
                      pl.BlockSpec((K, tv), lambda p, i: (0, p * per + i)),    # evecs^T (bf16)
                      pl.BlockSpec((K, Cp), lambda p, i: (0, 0))],             # exp(-evals*t)
            out_specs=pl.BlockSpec((1, K, Cp), lambda p, i: (p, 0, 0)),
            scratch_shapes=[pltpu.VMEM((K, Cp), jnp.float32)]),
        compiler_params=pltpu.CompilerParams(
            dimension_semantics=("parallel", "arbitrary")),
    )(x_p, mass_p, evecs_t_p, coefs_p)

    spec = jnp.sum(partials, axis=0).astype(jnp.bfloat16)      # tiny (K, Cp)

    x_diffuse = pl.pallas_call(
        _from_basis_kernel,
        out_shape=jax.ShapeDtypeStruct((Vp, Cp), jnp.bfloat16),
        grid_spec=pltpu.PrefetchScalarGridSpec(
            num_scalar_prefetch=0, grid=(nvt,),
            in_specs=[pl.BlockSpec((tv, K), lambda i: (i, 0)),
                      pl.BlockSpec((K, Cp), lambda i: (0, 0))],
            out_specs=pl.BlockSpec((tv, Cp), lambda i: (i, 0))),
        compiler_params=pltpu.CompilerParams(dimension_semantics=("parallel",)),
    )(evecs_p, spec)
    return x_diffuse


# ----------------------------------------------------------------------------- #
# Fused gradient path: gx = gradX @ x_diffuse, gy = gradY @ x_diffuse (shared resident
# x_diffuse, two f32 accumulators), then SpatialGradientFeatures epilogue:
#   real = gx @ Wre - gy @ Wim ; imag = gy @ Wre + gx @ Wim ; out = tanh(gx*real+gy*imag)
# Epilogue dots use bf16 operands (Wre/Wim stored bf16); combine + tanh stays f32.
# ----------------------------------------------------------------------------- #
def _grad_block_kernel(gx_ref, gy_ref, xd_ref, wre_ref, wim_ref, o_ref, accx, accy,
                       *, tv, xd_resident):
    k = pl.program_id(1)

    @pl.when(k == 0)
    def _():
        accx[...] = jnp.zeros_like(accx)
        accy[...] = jnp.zeros_like(accy)

    if xd_resident:
        start = pl.multiple_of(k * tv, 128)
        xd = xd_ref[pl.ds(start, tv), :]
    else:
        xd = xd_ref[...]
    accx[...] += jnp.dot(gx_ref[...], xd, preferred_element_type=jnp.float32)
    accy[...] += jnp.dot(gy_ref[...], xd, preferred_element_type=jnp.float32)

    @pl.when(k == pl.num_programs(1) - 1)
    def _():
        gx = accx[...]
        gy = accy[...]
        gxb = gx.astype(jnp.bfloat16)
        gyb = gy.astype(jnp.bfloat16)
        wre = wre_ref[...]
        wim = wim_ref[...]
        real = (jnp.dot(gxb, wre, preferred_element_type=jnp.float32)
                - jnp.dot(gyb, wim, preferred_element_type=jnp.float32))
        imag = (jnp.dot(gyb, wre, preferred_element_type=jnp.float32)
                + jnp.dot(gxb, wim, preferred_element_type=jnp.float32))
        o_ref[...] = jnp.tanh(gx * real + gy * imag).astype(o_ref.dtype)


def grad_features_fused_pallas(gradX_p, gradY_p, xd_p, wre_p, wim_p, Vp, Cp, tv):
    nvt = Vp // tv
    # keep x_diffuse resident unless it would dominate VMEM (then stream per k tile)
    xd_resident = (Vp * Cp * 2) <= (12 << 20)
    if xd_resident:
        xd_spec = pl.BlockSpec((Vp, Cp), lambda i, k: (0, 0))
        xd_bytes = 2 * Vp * Cp * 2
    else:
        xd_spec = pl.BlockSpec((tv, Cp), lambda i, k: (k, 0))
        xd_bytes = 2 * tv * Cp * 2
    vmem_bytes = (2 * 2 * tv * tv * 2          # gradX/gradY tiles, double-buffered bf16
                  + xd_bytes                   # x_diffuse (resident or streamed)
                  + 2 * 2 * Cp * Cp * 2        # Wre/Wim
                  + 2 * tv * Cp * 2            # output, double-buffered bf16
                  + 2 * tv * Cp * 4)           # f32 accumulators
    return pl.pallas_call(
        functools.partial(_grad_block_kernel, tv=tv, xd_resident=xd_resident),
        out_shape=jax.ShapeDtypeStruct((Vp, Cp), jnp.bfloat16),
        grid_spec=pltpu.PrefetchScalarGridSpec(
            num_scalar_prefetch=0, grid=(nvt, nvt),
            in_specs=[pl.BlockSpec((tv, tv), lambda i, k: (i, k)),    # gradX tile
                      pl.BlockSpec((tv, tv), lambda i, k: (i, k)),    # gradY tile
                      xd_spec,                                        # x_diffuse
                      pl.BlockSpec((Cp, Cp), lambda i, k: (0, 0)),    # A_re (bf16, resident)
                      pl.BlockSpec((Cp, Cp), lambda i, k: (0, 0))],   # A_im (bf16, resident)
            out_specs=pl.BlockSpec((tv, Cp), lambda i, k: (i, 0)),
            scratch_shapes=[pltpu.VMEM((tv, Cp), jnp.float32),
                            pltpu.VMEM((tv, Cp), jnp.float32)]),
        compiler_params=pltpu.CompilerParams(
            dimension_semantics=("parallel", "arbitrary"),
            vmem_limit_bytes=_vmem_limit(vmem_bytes)),
        cost_estimate=pl.CostEstimate(
            flops=4 * Vp * Vp * Cp + 8 * Vp * Cp * Cp,
            transcendentals=Vp * Cp,
            bytes_accessed=2 * Vp * Vp * 2 + Vp * Cp * 2 + 2 * Cp * Cp * 2 + Vp * Cp * 2),
    )(gradX_p, gradY_p, xd_p, wre_p, wim_p)


# ----------------------------------------------------------------------------- #
# Fused distance + sinkhorn input prep:  log_p0 = scale * (-2 x@y^T + |x|^2 + |y|^2)
# (scale = -1/(2 sigma^2 mean(d)), mean computed analytically outside the kernel).
# Single-K (feature dim resident) -> no accumulator; f32 operands (cdist fidelity).
# ----------------------------------------------------------------------------- #
def _dist_logp_kernel(x_ref, yt_ref, vx_ref, vy_ref, scale_ref, o_ref):
    acc = jnp.dot(x_ref[...], yt_ref[...], preferred_element_type=jnp.float32)
    d = -2.0 * acc + vx_ref[...] + vy_ref[...]
    o_ref[...] = d * scale_ref[...]


# ----------------------------------------------------------------------------- #
# Sinkhorn on the PADDED (Mp, Np) matrix: padded rows/cols are masked to a large
# negative each iteration so the logsumexps see only the real Nx x Ny block; the
# padded entries of the output P are exactly 0, so P can feed padded matmuls directly.
# ----------------------------------------------------------------------------- #
def _sinkhorn_kernel(logp_ref, p_ref, *, num_sink, nx, ny):
    Mp, Np = logp_ref.shape
    NEG = jnp.float32(-1e30)
    valid = ((lax.broadcasted_iota(jnp.int32, (Mp, Np), 0) < nx)
             & (lax.broadcasted_iota(jnp.int32, (Mp, Np), 1) < ny))
    lp = jnp.where(valid, logp_ref[...], NEG)

    def lse_rows(x):
        m = jnp.max(x, axis=1, keepdims=True)
        return jnp.log(jnp.sum(jnp.exp(x - m), axis=1, keepdims=True)) + m

    def lse_cols(x):
        m = jnp.max(x, axis=0, keepdims=True)
        return jnp.log(jnp.sum(jnp.exp(x - m), axis=0, keepdims=True)) + m

    def body(_, cur):
        cur = jnp.where(valid, cur - lse_rows(cur), NEG)
        cur = jnp.where(valid, cur - lse_cols(cur), NEG)
        return cur

    lp = lax.fori_loop(0, num_sink, body, lp)
    lp = lp - lse_rows(lp)
    p_ref[...] = jnp.where(valid, jnp.exp(lp), 0.0)


def feat_correspondences_pallas(feat_x, feat_y, sigma=0.1, num_sink=10, tm=512, tn=512):
    """Returns the PADDED (Mp, Np) correspondence matrix; padded entries are 0."""
    Nx, D = feat_x.shape
    Ny = feat_y.shape[0]
    fx = feat_x.astype(jnp.float32)
    fy = feat_y.astype(jnp.float32)
    vx = jnp.sum(fx * fx, axis=1, keepdims=True)        # (Nx, 1)
    vy = jnp.sum(fy * fy, axis=1, keepdims=True)        # (Ny, 1)
    # mean(d) analytically so /mean and -1/(2 sigma^2) fuse into the GEMM epilogue
    mean_d = (-2.0 * jnp.dot(jnp.sum(fx, axis=0), jnp.sum(fy, axis=0)) / (Nx * Ny)
              + jnp.mean(vx) + jnp.mean(vy))
    scale = (-1.0 / (2.0 * sigma * sigma)) / mean_d

    tm, tn = _pick_tile(Nx, tm), _pick_tile(Ny, tn)
    Kp = _round_up(D, 128)
    Mp, Np = _round_up(Nx, tm), _round_up(Ny, tn)
    x_p = jnp.pad(fx, ((0, Mp - Nx), (0, Kp - D)))
    yt_p = jnp.pad(fy.T, ((0, Kp - D), (0, Np - Ny)))
    vx_p = jnp.pad(vx, ((0, Mp - Nx), (0, 0)))
    vy_p = jnp.pad(vy.T, ((0, 0), (0, Np - Ny)))
    scale_arr = jnp.reshape(scale.astype(jnp.float32), (1, 1))

    log_p0 = pl.pallas_call(
        _dist_logp_kernel,
        out_shape=jax.ShapeDtypeStruct((Mp, Np), jnp.float32),
        grid_spec=pltpu.PrefetchScalarGridSpec(
            num_scalar_prefetch=0, grid=(Mp // tm, Np // tn),
            in_specs=[pl.BlockSpec((tm, Kp), lambda i, j: (i, 0)),
                      pl.BlockSpec((Kp, tn), lambda i, j: (0, j)),
                      pl.BlockSpec((tm, 1), lambda i, j: (i, 0)),
                      pl.BlockSpec((1, tn), lambda i, j: (0, j)),
                      pl.BlockSpec((1, 1), lambda i, j: (0, 0))],
            out_specs=pl.BlockSpec((tm, tn), lambda i, j: (i, j))),
        compiler_params=pltpu.CompilerParams(
            dimension_semantics=("parallel", "parallel")),
    )(x_p, yt_p, vx_p, vy_p, scale_arr)

    # TODO(synk): for meshes where Mp*Np*4 exceeds the scoped VMEM budget (esp. v7x,
    # 64 MiB physical) the sinkhorn loop must be re-tiled with streamed row/col LSEs.
    sink_vmem = 8 * Mp * Np * 4
    p_pad = pl.pallas_call(
        functools.partial(_sinkhorn_kernel, num_sink=num_sink, nx=Nx, ny=Ny),
        out_shape=jax.ShapeDtypeStruct((Mp, Np), jnp.float32),
        grid_spec=pltpu.PrefetchScalarGridSpec(
            num_scalar_prefetch=0, grid=(1,),
            in_specs=[pl.BlockSpec((Mp, Np), lambda i: (0, 0))],
            out_specs=pl.BlockSpec((Mp, Np), lambda i: (0, 0))),
        compiler_params=pltpu.CompilerParams(
            vmem_limit_bytes=_vmem_limit(sink_vmem)),
    )(log_p0)
    return p_pad


# ----------------------------------------------------------------------------- #
# Parameter init (deterministic, shapes from the PyTorch __init__).
# Linear weights stored PRE-TRANSPOSED as (in, out); mlp0 split into three (C, C)
# chunks so the concat(x, x_diffuse, x_grad) never materializes.
# ----------------------------------------------------------------------------- #
def init_linear_t(key, in_dim, out_dim):
    k1, k2 = jax.random.split(key)
    bound = 1.0 / jnp.sqrt(jnp.float32(in_dim))
    Wt = jax.random.uniform(k1, (in_dim, out_dim), jnp.float32, -bound, bound)
    b = jax.random.uniform(k2, (out_dim,), jnp.float32, -bound, bound)
    return Wt, b


def init_params(key, C_in, C_out, C_width=128, N_block=4):
    keys = jax.random.split(key, 2 + N_block)
    params = {
        "first_lin": init_linear_t(keys[0], C_in, C_width),
        "last_lin": init_linear_t(keys[1], C_width, C_out),
        "blocks": [],
    }
    for i in range(N_block):
        bk = jax.random.split(keys[2 + i], 6)
        bound = 1.0 / jnp.sqrt(jnp.float32(C_width))
        Wt0, b0 = init_linear_t(bk[3], 3 * C_width, C_width)
        params["blocks"].append({
            # PyTorch: nn.init.constant_(0.0), forward clamps to min=1e-8.
            "diffusion_time": jnp.zeros((C_width,), jnp.float32),
            # A_re / A_im are bias-free nn.Linear(C, C); stored pre-transposed (in, out)
            "A_re_t": jax.random.uniform(bk[1], (C_width, C_width), jnp.float32, -bound, bound),
            "A_im_t": jax.random.uniform(bk[2], (C_width, C_width), jnp.float32, -bound, bound),
            "mlp0_w": (Wt0[:C_width], Wt0[C_width:2 * C_width], Wt0[2 * C_width:]),
            "mlp0_b": b0,
            "mlp1": init_linear_t(bk[4], C_width, C_width),
            "mlp2": init_linear_t(bk[5], C_width, C_width),
        })
    return params


# ----------------------------------------------------------------------------- #
# DiffusionNet forward (unbatched [V, C]; eval mode -> dropout is identity).
# Activations stay in padded (Vp, Cp) bf16 layout for the whole forward.
# ----------------------------------------------------------------------------- #
def diffusion_net_forward(params, x_in, mass, evals, evecs, gradX, gradY):
    V, C_in = x_in.shape
    C = params["first_lin"][0].shape[1]
    C_out = params["last_lin"][0].shape[1]
    K = evecs.shape[1]
    Cp = _round_up(C, 128)
    Cinp = _round_up(C_in, 128)
    Coutp = _round_up(C_out, 128)
    tv = _pick_tile(V, 512)
    Vp = _round_up(V, tv)

    # one-time prep of the big operator matrices (padded + bf16), reused by all blocks
    gradX_p = _pad2(gradX, Vp, Vp, jnp.bfloat16)
    gradY_p = _pad2(gradY, Vp, Vp, jnp.bfloat16)
    evecs_p = _pad2(evecs, Vp, K, jnp.bfloat16)       # (Vp, K)
    evecs_t_p = evecs_p.T                             # (K, Vp), once
    mass_p = jnp.pad(mass.astype(jnp.float32), ((0, Vp - V),)).reshape(Vp, 1)

    # first linear: pad the raw descriptors ONCE; everything downstream is padded bf16
    x_p = _pad2(x_in, Vp, Cinp, jnp.bfloat16)
    w_fl = _pad2(params["first_lin"][0], Cinp, Cp, jnp.bfloat16)
    b_fl = jnp.pad(params["first_lin"][1].astype(jnp.float32), (0, Cp - C)).reshape(1, Cp)
    x = linear_single_k_pallas(x_p, w_fl, b_fl, jnp.bfloat16, tv=tv)

    for blk in params["blocks"]:
        t = jnp.maximum(blk["diffusion_time"], 1e-8)          # torch.clamp(min=1e-8)
        coefs = jnp.exp(-evals[:, None] * t[None, :])         # (K, C) tiny -> plain JAX
        coefs_p = jnp.pad(coefs.astype(jnp.float32), ((0, 0), (0, Cp - C)))

        x_diffuse = spectral_diffusion_pallas(x, mass_p, evecs_p, evecs_t_p, coefs_p,
                                              Vp=Vp, Cp=Cp, K=K, tv=tv)

        wre = _pad2(blk["A_re_t"], Cp, Cp, jnp.bfloat16)
        wim = _pad2(blk["A_im_t"], Cp, Cp, jnp.bfloat16)
        x_grad = grad_features_fused_pallas(gradX_p, gradY_p, x_diffuse, wre, wim,
                                            Vp=Vp, Cp=Cp, tv=tv)

        w0a = _pad2(blk["mlp0_w"][0], Cp, Cp, jnp.bfloat16)
        w0b = _pad2(blk["mlp0_w"][1], Cp, Cp, jnp.bfloat16)
        w0c = _pad2(blk["mlp0_w"][2], Cp, Cp, jnp.bfloat16)
        b0 = jnp.pad(blk["mlp0_b"].astype(jnp.float32), (0, Cp - C)).reshape(1, Cp)
        w1 = _pad2(blk["mlp1"][0], Cp, Cp, jnp.bfloat16)
        b1 = jnp.pad(blk["mlp1"][1].astype(jnp.float32), (0, Cp - C)).reshape(1, Cp)
        w2 = _pad2(blk["mlp2"][0], Cp, Cp, jnp.bfloat16)
        b2 = jnp.pad(blk["mlp2"][1].astype(jnp.float32), (0, Cp - C)).reshape(1, Cp)
        x = block_mlp_fused_pallas(x, x_diffuse, x_grad, w0a, w0b, w0c, b0,
                                   w1, b1, w2, b2, Vp=Vp, Cp=Cp, tv=tv)

    w_ll = _pad2(params["last_lin"][0], Cp, Coutp, jnp.bfloat16)
    b_ll = jnp.pad(params["last_lin"][1].astype(jnp.float32),
                   (0, Coutp - C_out)).reshape(1, Coutp)
    out = linear_single_k_pallas(x, w_ll, b_ll, jnp.float32, tv=tv)
    return out[:V, :C_out]                                   # single slice at the end


# ----------------------------------------------------------------------------- #
# SSWFMNet pieces
# ----------------------------------------------------------------------------- #
def wavelet_c_reg(feat_x, feat_y, evecs_trans_x, evecs_trans_y, gs_x, gs_y, lambda_param):
    # keep this path in f32 (the 1e-13 regularized solve is precision-sensitive)
    A = matmul_pallas(evecs_trans_x, feat_x, bf16=False)     # (Kx, C)
    B = matmul_pallas(evecs_trans_y, feat_y, bf16=False)     # (Ky, C)
    scaling = jnp.maximum(jnp.max(gs_x), jnp.max(gs_y))
    gs_x = gs_x / scaling
    gs_y = gs_y / scaling
    # Ds[i, j] = sum_s (gs_x[s, j] - gs_y[s, i])^2
    Ds = jnp.sum((gs_x[:, None, :] - gs_y[:, :, None]) ** 2, axis=0)
    A_A_T = matmul_pallas(A, A.T, bf16=False)
    A_B_T = matmul_pallas(A, B.T, bf16=False)
    # TODO(synk): torch.linalg.lstsq has no Pallas equivalent; the square full-rank
    # regularized systems are solved with a batched jnp.linalg.solve in plain JAX.
    M = A_A_T[None, :, :] + lambda_param * jax.vmap(jnp.diag)(Ds)
    rhs = A_B_T.T[:, :, None]
    C = jnp.linalg.solve(M, rhs)[..., 0]
    return C


def sswfm_forward(params, inputs_x, inputs_y, lambda_param=1e-13):
    (descs_x, massvec_x, evals_x, evecs_x, gs_x, gradX_x, gradY_x,
     _elevals_x, _elevecs_x, _name_x) = inputs_x
    (descs_y, massvec_y, evals_y, evecs_y, gs_y, gradX_y, gradY_y,
     _elevals_y, _elevecs_y, _name_y) = inputs_y

    feat_x = diffusion_net_forward(params, descs_x, massvec_x, evals_x, evecs_x,
                                   gradX_x, gradY_x)
    feat_y = diffusion_net_forward(params, descs_y, massvec_y, evals_y, evecs_y,
                                   gradX_y, gradY_y)

    feat_x = feat_x / jnp.linalg.norm(feat_x, axis=1, keepdims=True)
    feat_y = feat_y / jnp.linalg.norm(feat_y, axis=1, keepdims=True)

    evecs_x = evecs_x[:, :220]
    evecs_y = evecs_y[:, :220]
    gs_x = gs_x[:, :220]
    gs_y = gs_y[:, :220]

    evecs_trans_x = (evecs_x * massvec_x[:, None]).T
    evecs_trans_y = (evecs_y * massvec_y[:, None]).T

    C21 = wavelet_c_reg(feat_y, feat_x, evecs_trans_y, evecs_trans_x, gs_y, gs_x,
                        lambda_param)

    # feat_correspondences: fused dist_mat + scaling + padded-aware sinkhorn.
    # Pxy_p is padded (Mp, Np) with exact zeros in the padding -> feeds padded matmuls
    # directly (no slice / re-pad passes); Pxy matmuls stay f32 (tiny probabilities).
    Pxy_p = feat_correspondences_pallas(feat_x, feat_y, sigma=0.1, num_sink=10)
    Nx = feat_x.shape[0]
    Ny = feat_y.shape[0]
    Mp, Np = Pxy_p.shape
    K220 = evecs_y.shape[1]
    Kp220 = _round_up(K220, 128)
    evecs_y_p = jnp.pad(evecs_y.astype(jnp.float32),
                        ((0, Np - Ny), (0, Kp220 - K220)))
    tmp = matmul_pallas(Pxy_p, evecs_y_p, bf16=False)              # (Mp, Kp220)
    C21T_p = jnp.pad(C21.T, ((0, Kp220 - K220), (0, Kp220 - K220)))
    pred = matmul_pallas(tmp, C21T_p, bf16=False)[:Nx, :K220]
    loss = jnp.mean((evecs_x - pred) ** 2)                         # nn.MSELoss()
    return loss


# ----------------------------------------------------------------------------- #
if __name__ == "__main__":
    key = jax.random.PRNGKey(0)
    N, K, Nf, C_in, C_out = 128, 32, 4, 16, 32
    kp, kx, ky = jax.random.split(key, 3)
    params = init_params(kp, C_in, C_out, C_width=128, N_block=4)

    def make_shape_inputs(k, name):
        ks = jax.random.split(k, 8)
        descs = jax.random.normal(ks[0], (N, C_in), jnp.float32)
        mass = jax.random.uniform(ks[1], (N,), jnp.float32, 0.5, 1.5)
        evals = jnp.sort(jnp.abs(jax.random.normal(ks[2], (K,), jnp.float32)))
        evecs = jax.random.normal(ks[3], (N, K), jnp.float32) / jnp.sqrt(jnp.float32(N))
        gs = jax.random.uniform(ks[4], (Nf, K), jnp.float32, 0.1, 1.0)
        gradX = jax.random.normal(ks[5], (N, N), jnp.float32) * 0.05
        gradY = jax.random.normal(ks[6], (N, N), jnp.float32) * 0.05
        elevals = jnp.abs(jax.random.normal(ks[7], (K,), jnp.float32))
        elevecs = jax.random.normal(ks[7], (N, K), jnp.float32)
        return (descs, mass, evals, evecs, gs, gradX, gradY, elevals, elevecs, name)

    inputs_x = make_shape_inputs(kx, "shape_x")
    inputs_y = make_shape_inputs(ky, "shape_y")

    loss = sswfm_forward(params, inputs_x, inputs_y)
    loss = jax.block_until_ready(loss)
    assert jnp.isfinite(loss), "loss is not finite"
    print("KERNEL_OK")
</pallas_src>

<mosaic_0001>
module attributes {stable_mosaic.version = 11 : i64} {
  func.func @_linear_sk_kernel(%arg0: i32, %arg1: memref<128x128xbf16, #tpu.memory_space<vmem>>, %arg2: memref<128x128xbf16, #tpu.memory_space<vmem>>, %arg3: memref<1x128xf32, #tpu.memory_space<vmem>>, %arg4: memref<128x128xbf16, #tpu.memory_space<vmem>>) attributes {dimension_semantics = [#tpu.dimension_semantics<parallel>], iteration_bounds = array<i64: 1>, scalar_prefetch = 0 : i64, scratch_operands = 0 : i64, tpu.core_type = #tpu.core_type<tc>, window_params = [{transform_indices = @transform_0, window_bounds = array<i64: 128, 128>}, {pipeline_mode = #tpu.pipeline_mode<synchronous>, transform_indices = @transform_1, window_bounds = array<i64: 128, 128>}, {pipeline_mode = #tpu.pipeline_mode<synchronous>, transform_indices = @transform_2, window_bounds = array<i64: 1, 128>}, {transform_indices = @transform_3, window_bounds = array<i64: 128, 128>}]} {
    %c0 = arith.constant 0 : index
    %c0_0 = arith.constant 0 : index
    %0 = vector.load %arg1[%c0, %c0_0] : memref<128x128xbf16, #tpu.memory_space<vmem>>, vector<128x128xbf16>
    %c0_1 = arith.constant 0 : index
    %c0_2 = arith.constant 0 : index
    %1 = vector.load %arg2[%c0_1, %c0_2] : memref<128x128xbf16, #tpu.memory_space<vmem>>, vector<128x128xbf16>
    %cst = arith.constant dense<0.000000e+00> : vector<128x128xf32>
    %2 = tpu.matmul %0, %1, %cst {dimension_numbers = #tpu.dot_dimension_numbers<[1], [0], [0], [1], [0, 0, 1, 1], [], []>} : vector<128x128xbf16>, vector<128x128xbf16>, vector<128x128xf32> -> vector<128x128xf32>
    %c0_3 = arith.constant 0 : index
    %c0_4 = arith.constant 0 : index
    %3 = vector.load %arg3[%c0_3, %c0_4] : memref<1x128xf32, #tpu.memory_space<vmem>>, vector<1x128xf32>
    %4 = vector.broadcast %3 : vector<1x128xf32> to vector<128x128xf32>
    %5 = arith.addf %2, %4 : vector<128x128xf32>
    %6 = arith.truncf %5 : vector<128x128xf32> to vector<128x128xbf16>
    %c0_5 = arith.constant 0 : index
    %c0_6 = arith.constant 0 : index
    %7 = vector.load %arg4[%c0_5, %c0_6] : memref<128x128xbf16, #tpu.memory_space<vmem>>, vector<128x128xbf16>
    tpu.vector_store %arg4[%c0_5, %c0_6], %6 {strides = array<i32>} : memref<128x128xbf16, #tpu.memory_space<vmem>>, vector<128x128xbf16>,
    return
  }
  func.func @transform_0(%arg0: i32) -> (i32, i32) {
    %c0_i32 = arith.constant 0 : i32
    %c0_i32_0 = arith.constant 0 : i32
    return %arg0, %c0_i32 : i32, i32
  }
  func.func @transform_1(%arg0: i32) -> (i32, i32) {
    %c0_i32 = arith.constant 0 : i32
    %c0_i32_0 = arith.constant 0 : i32
    %c0_i32_1 = arith.constant 0 : i32
    return %c0_i32, %c0_i32_0 : i32, i32
  }
  func.func @transform_2(%arg0: i32) -> (i32, i32) {
    %c0_i32 = arith.constant 0 : i32
    %c0_i32_0 = arith.constant 0 : i32
    %c0_i32_1 = arith.constant 0 : i32
    return %c0_i32, %c0_i32_0 : i32, i32
  }
  func.func @transform_3(%arg0: i32) -> (i32, i32) {
    %c0_i32 = arith.constant 0 : i32
    %c0_i32_0 = arith.constant 0 : i32
    return %arg0, %c0_i32 : i32, i32
  }
}

</mosaic_0001>

<bundles_post_ra>
// kernel: tpu_custom_call.1
= control target key start
LH: loop header
LB: loop body
LE: loop exit
PB: predicated region body
PF: predicated region fallthrough
CT: control target
= control target key end

     0   :  { %8 = vsyncpa [#allocation3], 0  ;;  %s700_s0 = inlined_call_operand.hbm [shape: bf16[128,128], index: 0, kind: input, shape index: {}]   ;;  %s701_s1 = inlined_call_operand.hbm [shape: bf16[128,128], index: 1, kind: input, shape index: {}]   ;;  %s702_s2 = inlined_call_operand.vmem [shape: f32[1,128], index: 2, kind: input, shape index: {}]   ;;  %s703_s3 = inlined_call_operand.hbm [shape: bf16[128,128], index: 3, kind: output, shape index: {}]  }
   0x1   :  { %9 = vsyncpa [#allocation6], 0 }
   0x2   :  { %10 = vsyncpa [#allocation4], 0  ;;  %s627_s12 = smov [#allocation2]   ;;  %s555_s16 = scalar_lea.hbm %s700_s0, 1024 }
   0x3   :  { %s16_s13 = sshll.u32 %s627_s12, 4  ;;  %p556_p0 = scmp.ne.s32.totalorder %s700_s0, %s555_s16  ;;  %s17_s13 = int_to_ptr.vmem [resolvable:$true] %s16_s13 }
   0x4   :  { %p559_p1 = scmp.lt.u32.totalorder %s555_s16, %s700_s0 }
   0x6   :  { %p561_p2 = pnand %p559_p1, %p556_p0 }
   0x8   :  { %564 = shalt.err (!%p561_p2)
}
   0x9   :  { %s565_s21 = scalar_lea.vmem %s17_s13, 1024  ;;  %p570_p4 = scmp.lt.s32.totalorder %s17_s13, %s17_s13 }
   0xa   :  { %p566_p3 = scmp.ne.s32.totalorder %s17_s13, %s565_s21  ;;  %p571_p5 = scmp.lt.s32.totalorder %s565_s21, %s565_s21 }
   0xc   :  { %p572_p6 = por %p571_p5, %p570_p4 }
   0xe   :  { %p573_p7 = pnand %p572_p6, %p566_p3 }
  0x10   :  { %576 = shalt.err (!%p573_p7)
}
  0x11   :  { %s628_s22 = smov 64   ;;  %s629_s23 = smov 4  }
  0x12   :  { %22 = dma.hbm_to_vmem [thread:$0]  %s700_s0, 1024, %s17_s13, [#allocation3], %s628_s22, %s628_s22, %s629_s23  }
  0x13   :  { %s630_s26 = smov [#allocation5]   ;;  %s577_s30 = scalar_lea.hbm %s701_s1, 1024 }
  0x14   :  { %s28_s27 = sshll.u32 %s630_s26, 4  ;;  %p578_p8 = scmp.ne.s32.totalorder %s701_s1, %s577_s30  ;;  %s29_s27 = int_to_ptr.vmem [resolvable:$true] %s28_s27 }
  0x15   :  { %p581_p9 = scmp.lt.u32.totalorder %s577_s30, %s701_s1 }
  0x17   :  { %p583_p10 = pnand %p581_p9, %p578_p8 }
  0x19   :  { %586 = shalt.err (!%p583_p10)
}
  0x1a   :  { %s587_s8 = scalar_lea.vmem %s29_s27, 1024  ;;  %p592_p12 = scmp.lt.s32.totalorder %s29_s27, %s29_s27 }
  0x1b   :  { %p588_p11 = scmp.ne.s32.totalorder %s29_s27, %s587_s8  ;;  %p593_p13 = scmp.lt.s32.totalorder %s587_s8, %s587_s8 }
  0x1d   :  { %p594_p0 = por %p593_p13, %p592_p12 }
  0x1f   :  { %p595_p1 = pnand %p594_p0, %p588_p11 }
  0x21   :  { %598 = shalt.err (!%p595_p1)
}
  0x22   :  { %34 = dma.hbm_to_vmem [thread:$0]  %s701_s1, 1024, %s29_s27, [#allocation6], %s628_s22, %s628_s22, %s629_s23  }
  0x23   :  { %621 = dma.done.wait [#allocation3], 1024  }
  0x24   :  { %622 = vsyncadd [#allocation3], 4294966272 }
  0x25   :  { %623 = dma.done.wait [#allocation6], 1024  }
  0x26   :  { %624 = vsyncadd [#allocation6], 4294966272  ;;  %v539_v0 = vld [vmem:[#allocation5] sm:$0xff]   ;;  %v540_v1 = vld [vmem:[#allocation5 + $0x8] sm:$0xff]  }
  0x27   :  { %486 = vmatprep.subr.bf16.mxu0 %v539_v0  ;;  %518 = vmatprep.subr.bf16.mxu1 %v539_v0  ;;  %v541_v2 = vld [vmem:[#allocation5 + $0x10] sm:$0xff]   ;;  %v542_v3 = vld [vmem:[#allocation5 + $0x18] sm:$0xff]   ;;  %v547_v4 = vld [vmem:[#allocation2] sm:$0xff]  }
  0x28   :  { %487 = vmatpush3.bf16.msra.mxu0 %v539_v0  ;;  %526 = vmatpush3.bf16.msra.mxu1 %v539_v0  ;;  %v548_v5 = vld [vmem:[#allocation2 + $0x20] sm:$0xff]   ;;  %v544_v7 = vld [vmem:[#allocation5 + $0x28] sm:$0xff]   ;;  %v545_v8 = vld [vmem:[#allocation5 + $0x30] sm:$0xff]  }
  0x29   :  { %488 = vmatprep.subr.bf16.mxu0 %v540_v1  ;;  %519 = vmatprep.subr.bf16.mxu1 %v540_v1  ;;  %v543_v6 = vld [vmem:[#allocation5 + $0x20] sm:$0xff]   ;;  %v546_v9 = vld [vmem:[#allocation5 + $0x38] sm:$0xff]   ;;  %v549_v10 = vld [vmem:[#allocation2 + $0x8] sm:$0xff]  }
  0x2a   :  { %502 = vmatprep.mubr.bf16.mxu0 %v547_v4  ;;  %510 = vmatprep.mubr.bf16.mxu1 %v548_v5  ;;  %v550_v11 = vld [vmem:[#allocation2 + $0x28] sm:$0xff]   ;;  %v551_v12 = vld [vmem:[#allocation2 + $0x10] sm:$0xff]   ;;  %v553_v14 = vld [vmem:[#allocation2 + $0x18] sm:$0xff]  }
  0x2b   :  { %v552_v13 = vld [vmem:[#allocation2 + $0x30] sm:$0xff]   ;;  %v554_v15 = vld [vmem:[#allocation2 + $0x38] sm:$0xff]   ;;  %v374_v17 = vld [vmem:[%s702_s2] ss:$0 sm:$0xff]  ;;  %s631_s2 = smov [#allocation7]  }
  0x2c   :  { %489 = vmatpush3.bf16.msra.mxu0 %v540_v1  ;;  %527 = vmatpush3.bf16.msra.mxu1 %v540_v1  ;;  %s361_s11 = sshll.u32 %s631_s2, 4  ;;  %s362_s11 = int_to_ptr.vmem [resolvable:$true] %s361_s11 }
  0x2d   :  { %490 = vmatprep.subr.bf16.mxu0 %v541_v2  ;;  %520 = vmatprep.subr.bf16.mxu1 %v541_v2  ;;  %s599_s12 = scalar_lea.vmem %s362_s11, 1024  ;;  %p604_p3 = scmp.lt.s32.totalorder %s362_s11, %s362_s11 }
  0x2e   :  { %p600_p2 = scmp.ne.s32.totalorder %s362_s11, %s599_s12  ;;  %p605_p4 = scmp.lt.s32.totalorder %s599_s12, %s599_s12 }
  0x30   :  { %491 = vmatpush3.bf16.msra.mxu0 %v541_v2  ;;  %528 = vmatpush3.bf16.msra.mxu1 %v541_v2  ;;  %p606_p5 = por %p605_p4, %p604_p3 }
  0x31   :  { %492 = vmatprep.subr.bf16.mxu0 %v542_v3  ;;  %521 = vmatprep.subr.bf16.mxu1 %v542_v3 }
  0x32   :  { %p607_p6 = pnand %p606_p5, %p600_p2 }
  0x34   :  { %493 = vmatpush3.bf16.msra.mxu0 %v542_v3  ;;  %529 = vmatpush3.bf16.msra.mxu1 %v542_v3 }
  0x35   :  { %494 = vmatprep.subr.bf16.mxu0 %v543_v6  ;;  %522 = vmatprep.subr.bf16.mxu1 %v543_v6 }
  0x38   :  { %495 = vmatpush3.bf16.msra.mxu0 %v543_v6  ;;  %530 = vmatpush3.bf16.msra.mxu1 %v543_v6 }
  0x39   :  { %496 = vmatprep.subr.bf16.mxu0 %v544_v7  ;;  %523 = vmatprep.subr.bf16.mxu1 %v544_v7 }
  0x3c   :  { %497 = vmatpush3.bf16.msra.mxu0 %v544_v7  ;;  %531 = vmatpush3.bf16.msra.mxu1 %v544_v7 }
  0x3d   :  { %498 = vmatprep.subr.bf16.mxu0 %v545_v8  ;;  %524 = vmatprep.subr.bf16.mxu1 %v545_v8 }
  0x40   :  { %499 = vmatpush3.bf16.msra.mxu0 %v545_v8  ;;  %532 = vmatpush3.bf16.msra.mxu1 %v545_v8 }
  0x41   :  { %500 = vmatprep.subr.bf16.mxu0 %v546_v9  ;;  %525 = vmatprep.subr.bf16.mxu1 %v546_v9 }
  0x44   :  { %501 = vmatpush3.bf16.msra.mxu0 %v546_v9  ;;  %533 = vmatpush3.bf16.msra.mxu1 %v546_v9 }
  0x47   :  { %503 = vmatmul.mubr.bf16.vlgmr.msra.gmra.mrb[0].mxu0 %v549_v10  ;;  %511 = vmatmul.mubr.bf16.vlgmr.msra.gmra.mrb[0].mxu1 %v550_v11 }
  0x48   :  { %506 = vmatprep.mubr.bf16.mxu0 %v551_v12  ;;  %514 = vmatprep.mubr.bf16.mxu1 %v552_v13 }
  0x4f   :  { %507 = vmatmul.mubr.bf16.gmra.mrb[4].mxu0 %v553_v14  ;;  %515 = vmatmul.mubr.bf16.gmra.mrb[4].mxu1 %v554_v15 }
 0x11a   :  { %v504_v16 = vpop.f32.mrb[0].mxu0  ;;  %v512_v18 = vpop.f32.mrb[0].mxu1 }
 0x11b   :  { %v213_v19 = vpop.f32.mrb[1].mxu0  ;;  %v245_v20 = vpop.f32.mrb[1].mxu1  ;;  %v222_v23 = vadd.f32 %v504_v16, %v374_v17  ;;  %v254_v24 = vadd.f32 %v512_v18, %v374_v17 }
 0x11c   :  { %v505_v21 = vpop.f32.mrb[2].mxu0  ;;  %v513_v22 = vpop.f32.mrb[2].mxu1  ;;  %v214_v29 = vadd.f32 %v374_v17, %v213_v19  ;;  %v246_v30 = vadd.f32 %v374_v17, %v245_v20 }
 0x11d   :  { %v225_v25 = vadd.f32 %v505_v21, %v374_v17  ;;  %v257_v26 = vadd.f32 %v513_v22, %v374_v17  ;;  %v216_v27 = vpop.f32.mrb[3].mxu0  ;;  %v248_v28 = vpop.f32.mrb[3].mxu1 }
 0x11e   :  { %v217_v31 = vadd.f32 %v374_v17, %v216_v27  ;;  %v249_v32 = vadd.f32 %v374_v17, %v248_v28 }
 0x11f   :  { %v431_v33 = vpack.c.bf16 %v225_v25, %v222_v23  ;;  %v451_v34 = vpack.c.bf16 %v257_v26, %v254_v24 }
 0x120   :  { %v426_v35 = vpack.c.bf16 %v217_v31, %v214_v29  ;;  %v446_v36 = vpack.c.bf16 %v249_v32, %v246_v30 }
 0x121   :  { %463 = vst [vmem:[#allocation7 + $0x8] sm:$0xff] %v431_v33   ;;  %467 = vst [vmem:[#allocation7 + $0x28] sm:$0xff] %v451_v34  }
 0x122   :  { %427 = vst [vmem:[#allocation7] sm:$0xff] %v426_v35   ;;  %466 = vst [vmem:[#allocation7 + $0x20] sm:$0xff] %v446_v36   ;;  %v508_v37 = vpop.f32.mrb[4].mxu0  ;;  %v516_v38 = vpop.f32.mrb[4].mxu1 }
 0x123   :  { %v229_v39 = vpop.f32.mrb[5].mxu0  ;;  %v261_v40 = vpop.f32.mrb[5].mxu1  ;;  %v238_v43 = vadd.f32 %v508_v37, %v374_v17  ;;  %v270_v44 = vadd.f32 %v516_v38, %v374_v17 }
 0x124   :  { %v509_v41 = vpop.f32.mrb[6].mxu0  ;;  %v517_v42 = vpop.f32.mrb[6].mxu1  ;;  %v230_v49 = vadd.f32 %v374_v17, %v229_v39  ;;  %v262_v50 = vadd.f32 %v374_v17, %v261_v40 }
 0x125   :  { %v241_v45 = vadd.f32 %v509_v41, %v374_v17  ;;  %v273_v46 = vadd.f32 %v517_v42, %v374_v17  ;;  %v232_v47 = vpop.f32.mrb[7].mxu0  ;;  %v264_v48 = vpop.f32.mrb[7].mxu1 }
 0x126   :  { %v233_v51 = vadd.f32 %v374_v17, %v232_v47  ;;  %v265_v52 = vadd.f32 %v374_v17, %v264_v48 }
 0x127   :  { %v441_v53 = vpack.c.bf16 %v241_v45, %v238_v43  ;;  %v461_v54 = vpack.c.bf16 %v273_v46, %v270_v44 }
 0x128   :  { %v436_v55 = vpack.c.bf16 %v233_v51, %v230_v49  ;;  %v456_v56 = vpack.c.bf16 %v265_v52, %v262_v50 }
 0x129   :  { %465 = vst [vmem:[#allocation7 + $0x18] sm:$0xff] %v441_v53   ;;  %469 = vst [vmem:[#allocation7 + $0x38] sm:$0xff] %v461_v54  }
 0x12a   :  { %464 = vst [vmem:[#allocation7 + $0x10] sm:$0xff] %v436_v55   ;;  %468 = vst [vmem:[#allocation7 + $0x30] sm:$0xff] %v456_v56  }
 0x12b   :  { %610 = shalt.err (!%p607_p6)
}
 0x12c   :  { %s611_s15 = scalar_lea.hbm %s703_s3, 1024 }
 0x12d   :  { %p612_p7 = scmp.ne.s32.totalorder %s703_s3, %s611_s15  ;;  %p615_p8 = scmp.lt.u32.totalorder %s611_s15, %s703_s3 }
 0x12f   :  { %p617_p9 = pnand %p615_p8, %p612_p7 }
 0x131   :  { %620 = shalt.err (!%p617_p9)
}
 0x132   :  { %367 = dma.vmem_to_hbm [thread:$0]  %s362_s11, 1024, %s703_s3, [#allocation4], %s628_s22, %s628_s22, %s629_s23  }
 0x133   :  { %625 = dma.done.wait [#allocation4], 1024  }
 0x134   :  { %626 = vsyncadd [#allocation4], 4294966272 }
 0x135   :  { %371 = vsyncpa [#allocation3], 1 }
 0x136   :  { %372 = vsyncpa [#allocation6], 1 }
 0x137   :  { %373 = vsyncpa [#allocation4], 1 }

</bundles_post_ra>
